<compile_context>
chip_gen: v6e
topology: v6e:2x2x1
jax: 0.10.0
libtpu: 0.0.40
codegen_flags: <defaults>
</compile_context>

<pallas_src>
import jax
import jax.numpy as jnp
from jax.experimental import pallas as pl
from jax.experimental.pallas import tpu as pltpu
from math import prod

EPS = 1e-6
LANES = 128
MAX_BLOCK_BYTES = 4 * 1024 * 1024   # per input, per pipeline buffer (~4 MiB)
MAX_ACC_ROWS = 64                   # accumulator rows -> 8 independent vreg chains
NUM_SPLITS = 2                      # leading "parallel" grid axis (both TCs on v7x)


def _make_kernel(rows_valid, tile_rows, tiles_per_split, acc_rows, eps):
    # Plain Python float -> traced as a jaxpr literal (no captured constants).
    eps2 = float(eps) * float(eps)

    def kernel(x_ref, y_ref, o_ref):
        c = pl.program_id(0)   # parallel split
        i = pl.program_id(1)   # sequential reduction step within the split

        @pl.when(i == 0)
        def _():
            o_ref[...] = jnp.zeros_like(o_ref)

        d = x_ref[...].astype(jnp.float32) - y_ref[...].astype(jnp.float32)
        s = jnp.sqrt(d * d + eps2)          # hoisted above both branches (EUP)

        row_start = (c * tiles_per_split + i) * tile_rows

        def accumulate(vals):
            # Fold tile_rows onto acc_rows with pure VPU adds.  acc_rows = 64
            # gives 8 independent (8,128) accumulation chains, keeping the f32
            # add latency hidden under the per-step DMA.
            o_ref[...] += vals.reshape(tile_rows // acc_rows, acc_rows, LANES).sum(axis=0)[None]

        is_full = row_start + tile_rows <= rows_valid

        # Fast path: whole tile lies within the valid rows.
        @pl.when(is_full)
        def _():
            accumulate(s)

        # Slow path: ragged last tile.  Pallas leaves the out-of-bounds rows of
        # the VMEM block unspecified (garbage); the row mask is a select, so
        # NaN/Inf garbage never contaminates the sum.  Row-relative indexing
        # keeps everything comfortably inside int32 even for huge inputs.
        @pl.when(jnp.logical_not(is_full))
        def _():
            r = jax.lax.broadcasted_iota(jnp.int32, (tile_rows, LANES), 0)
            accumulate(jnp.where(row_start + r < rows_valid, s, 0.0))

    return kernel


def _acc_rows_for(tile_rows):
    for a in (MAX_ACC_ROWS, 32, 16, 8):
        if tile_rows % a == 0:
            return a
    return tile_rows


def _row_align(dtype):
    # Packed sublane tiling: (8,128) f32, (16,128) bf16/f16, (32,128) int8/fp8.
    return 8 * max(1, 4 // jnp.dtype(dtype).itemsize)


def charbonnier_loss(x, y, eps=EPS):
    """sum(sqrt((x - y)^2 + eps^2)) / numel(y), matching the PyTorch module."""
    assert x.shape == y.shape
    n = int(prod(y.shape))

    xf = x.reshape(-1)
    yf = y.reshape(-1)

    n_main = (n // LANES) * LANES       # handled by the Pallas kernel
    tail = n - n_main                   # < 128 elements -> plain XLA sum

    total = jnp.zeros((), jnp.float32)

    if tail:
        # Tiny ragged tail summed in XLA instead of padding/relayouting both
        # full inputs in HBM.
        dt = xf[n_main:].astype(jnp.float32) - yf[n_main:].astype(jnp.float32)
        total = total + jnp.sum(jnp.sqrt(dt * dt + float(eps) * float(eps)))

    if n_main:
        if tail:
            # TODO(synk): when n % 128 != 0 this slice still materializes one
            # copy of each input's main part; feeding the natural 2-D shape with
            # in-kernel lane masking would remove it at the cost of lane
            # under-utilization.  For n % 128 == 0 the path below is copy-free.
            xm, ym = xf[:n_main], yf[:n_main]
        else:
            xm, ym = xf, yf          # reshape below is a pure bitcast, no copy

        rows = n_main // LANES
        x2 = xm.reshape(rows, LANES)
        y2 = ym.reshape(rows, LANES)

        itemsize = max(jnp.dtype(x.dtype).itemsize, jnp.dtype(y.dtype).itemsize)
        max_tile_rows = MAX_BLOCK_BYTES // (LANES * itemsize)   # 8192 f32 / 16384 bf16
        # max_tile_rows is a multiple of every packed-sublane alignment and of 64.
        assert max_tile_rows % max(_row_align(x.dtype), _row_align(y.dtype)) == 0

        if rows >= max_tile_rows:
            tile_rows = max_tile_rows
        else:
            tile_rows = rows         # full-extent block: any size is legal

        num_tiles = pl.cdiv(rows, tile_rows)
        # Use the 2-way split only when it divides evenly -> no phantom tile DMA.
        # Harmless serial loop on single-TC v5e/v6e.
        num_splits = NUM_SPLITS if (num_tiles % NUM_SPLITS == 0) else 1
        tiles_per_split = num_tiles // num_splits
        acc_rows = _acc_rows_for(tile_rows)

        kernel = _make_kernel(rows, tile_rows, tiles_per_split, acc_rows, eps)

        def in_map(c, i):
            return (c * tiles_per_split + i, 0)

        bytes_in = n_main * (jnp.dtype(x.dtype).itemsize + jnp.dtype(y.dtype).itemsize)

        partials = pl.pallas_call(
            kernel,
            out_shape=jax.ShapeDtypeStruct((num_splits, acc_rows, LANES), jnp.float32),
            grid_spec=pltpu.PrefetchScalarGridSpec(
                num_scalar_prefetch=0,
                grid=(num_splits, tiles_per_split),
                in_specs=[
                    pl.BlockSpec((tile_rows, LANES), in_map),
                    pl.BlockSpec((tile_rows, LANES), in_map),
                ],
                out_specs=pl.BlockSpec((1, acc_rows, LANES), lambda c, i: (c, 0, 0)),
            ),
            compiler_params=pltpu.CompilerParams(
                # TODO(synk): on v7x, pltpu.CORE_PARALLEL on the leading axis (or
                # pl.core_map over a TensorCore mesh) would guarantee both TCs
                # drive their own DMA stream; kept "parallel" for portability.
                dimension_semantics=("parallel", "arbitrary"),
                vmem_limit_bytes=32 * 1024 * 1024,
            ),
            cost_estimate=pl.CostEstimate(
                flops=4 * n_main,
                transcendentals=n_main,
                bytes_accessed=int(bytes_in) + num_splits * acc_rows * LANES * 4,
            ),
        )(x2, y2)

        total = total + jnp.sum(partials)

    return total / n


def charbonnier_loss_ref(x, y, eps=EPS):
    xf = x.astype(jnp.float32)
    yf = y.astype(jnp.float32)
    return jnp.sum(jnp.sqrt((xf - yf) ** 2 + eps ** 2)) / prod(y.shape)


if __name__ == "__main__":
    key = jax.random.PRNGKey(0)
    kx, ky = jax.random.split(key)
    # NCHW inputs, like the PyTorch module's typical usage
    x = jax.random.normal(kx, (2, 4, 16, 16), dtype=jnp.float32)
    y = jax.random.normal(ky, (2, 4, 16, 16), dtype=jnp.float32)

    out = jax.block_until_ready(charbonnier_loss(x, y))
    ref = charbonnier_loss_ref(x, y)

    assert jnp.allclose(out, ref, rtol=1e-5, atol=1e-6), (out, ref)
    print("KERNEL_OK")
</pallas_src>

<mosaic_0001>
module attributes {stable_mosaic.version = 11 : i64} {
  func.func @kernel(%arg0: i32, %arg1: i32, %arg2: memref<16x128xf32, #tpu.memory_space<vmem>>, %arg3: memref<16x128xf32, #tpu.memory_space<vmem>>, %arg4: memref<1x16x128xf32, #tpu.memory_space<vmem>>) attributes {dimension_semantics = [#tpu.dimension_semantics<parallel>, #tpu.dimension_semantics<arbitrary>], iteration_bounds = array<i64: 1, 1>, scalar_prefetch = 0 : i64, scratch_operands = 0 : i64, tpu.core_type = #tpu.core_type<tc>, window_params = [{transform_indices = @transform_0, window_bounds = array<i64: 16, 128>}, {transform_indices = @transform_1, window_bounds = array<i64: 16, 128>}, {transform_indices = @transform_2, window_bounds = array<i64: 1, 16, 128>}]} {
    %c0_i32 = arith.constant 0 : i32
    %0 = arith.cmpi eq, %arg1, %c0_i32 : i32
    %1 = arith.extui %0 : i1 to i32
    %c0_i32_0 = arith.constant 0 : i32
    %2 = arith.cmpi ne, %1, %c0_i32_0 : i32
    scf.if %2 {
      %cst_8 = arith.constant 0.000000e+00 : f32
      %20 = vector.broadcast %cst_8 : f32 to vector<1x16x128xf32>
      %c0_9 = arith.constant 0 : index
      %c0_10 = arith.constant 0 : index
      %c0_11 = arith.constant 0 : index
      %21 = vector.load %arg4[%c0_9, %c0_10, %c0_11] : memref<1x16x128xf32, #tpu.memory_space<vmem>>, vector<1x16x128xf32>
      tpu.vector_store %arg4[%c0_9, %c0_10, %c0_11], %20 {strides = array<i32>} : memref<1x16x128xf32, #tpu.memory_space<vmem>>, vector<1x16x128xf32>,
    } else {
    }
    %c0 = arith.constant 0 : index
    %c0_1 = arith.constant 0 : index
    %3 = vector.load %arg2[%c0, %c0_1] : memref<16x128xf32, #tpu.memory_space<vmem>>, vector<16x128xf32>
    %c0_2 = arith.constant 0 : index
    %c0_3 = arith.constant 0 : index
    %4 = vector.load %arg3[%c0_2, %c0_3] : memref<16x128xf32, #tpu.memory_space<vmem>>, vector<16x128xf32>
    %5 = arith.subf %3, %4 : vector<16x128xf32>
    %6 = arith.mulf %5, %5 : vector<16x128xf32>
    %cst = arith.constant 9.99999996E-13 : f32
    %7 = vector.broadcast %cst : f32 to vector<16x128xf32>
    %8 = arith.addf %6, %7 : vector<16x128xf32>
    %9 = math.sqrt %8 : vector<16x128xf32>
    %c1_i32 = arith.constant 1 : i32
    %10 = arith.muli %arg0, %c1_i32 : i32
    %11 = arith.addi %10, %arg1 : i32
    %c16_i32 = arith.constant 16 : i32
    %12 = arith.muli %11, %c16_i32 : i32
    %c16_i32_4 = arith.constant 16 : i32
    %13 = arith.addi %12, %c16_i32_4 : i32
    %c16_i32_5 = arith.constant 16 : i32
    %14 = arith.cmpi sle, %13, %c16_i32_5 : i32
    %15 = arith.extui %14 : i1 to i32
    %c0_i32_6 = arith.constant 0 : i32
    %16 = arith.cmpi ne, %15, %c0_i32_6 : i32
    scf.if %16 {
      %c0_8 = arith.constant 0 : index
      %c0_9 = arith.constant 0 : index
      %c0_10 = arith.constant 0 : index
      %20 = vector.load %arg4[%c0_8, %c0_9, %c0_10] : memref<1x16x128xf32, #tpu.memory_space<vmem>>, vector<1x16x128xf32>
      %21 = vector.shape_cast %9 : vector<16x128xf32> to vector<1x16x128xf32>
      %cst_11 = arith.constant dense<0.000000e+00> : vector<16x128xf32>
      %22 = vector.multi_reduction <add>, %21, %cst_11 [0] : vector<1x16x128xf32> to vector<16x128xf32>
      %23 = vector.shape_cast %22 : vector<16x128xf32> to vector<1x16x128xf32>
      %24 = arith.addf %20, %23 : vector<1x16x128xf32>
      %c0_12 = arith.constant 0 : index
      %c0_13 = arith.constant 0 : index
      %c0_14 = arith.constant 0 : index
      %25 = vector.load %arg4[%c0_12, %c0_13, %c0_14] : memref<1x16x128xf32, #tpu.memory_space<vmem>>, vector<1x16x128xf32>
      tpu.vector_store %arg4[%c0_12, %c0_13, %c0_14], %24 {strides = array<i32>} : memref<1x16x128xf32, #tpu.memory_space<vmem>>, vector<1x16x128xf32>,
    } else {
    }
    %true = arith.constant true
    %17 = arith.xori %14, %true : i1
    %18 = arith.extui %17 : i1 to i32
    %c0_i32_7 = arith.constant 0 : i32
    %19 = arith.cmpi ne, %18, %c0_i32_7 : i32
    scf.if %19 {
      %20 = tpu.iota {dimensions = array<i32: 0>} : vector<16x128xi32>
      %21 = vector.broadcast %12 : i32 to vector<16x128xi32>
      %22 = arith.addi %21, %20 : vector<16x128xi32>
      %c16_i32_8 = arith.constant 16 : i32
      %23 = vector.broadcast %c16_i32_8 : i32 to vector<16x128xi32>
      %24 = arith.cmpi slt, %22, %23 : vector<16x128xi32>
      %cst_9 = arith.constant 0.000000e+00 : f32
      %25 = vector.broadcast %cst_9 : f32 to vector<16x128xf32>
      %26 = arith.select %24, %9, %25 : vector<16x128xi1>, vector<16x128xf32>
      %c0_10 = arith.constant 0 : index
      %c0_11 = arith.constant 0 : index
      %c0_12 = arith.constant 0 : index
      %27 = vector.load %arg4[%c0_10, %c0_11, %c0_12] : memref<1x16x128xf32, #tpu.memory_space<vmem>>, vector<1x16x128xf32>
      %28 = vector.shape_cast %26 : vector<16x128xf32> to vector<1x16x128xf32>
      %cst_13 = arith.constant dense<0.000000e+00> : vector<16x128xf32>
      %29 = vector.multi_reduction <add>, %28, %cst_13 [0] : vector<1x16x128xf32> to vector<16x128xf32>
      %30 = vector.shape_cast %29 : vector<16x128xf32> to vector<1x16x128xf32>
      %31 = arith.addf %27, %30 : vector<1x16x128xf32>
      %c0_14 = arith.constant 0 : index
      %c0_15 = arith.constant 0 : index
      %c0_16 = arith.constant 0 : index
      %32 = vector.load %arg4[%c0_14, %c0_15, %c0_16] : memref<1x16x128xf32, #tpu.memory_space<vmem>>, vector<1x16x128xf32>
      tpu.vector_store %arg4[%c0_14, %c0_15, %c0_16], %31 {strides = array<i32>} : memref<1x16x128xf32, #tpu.memory_space<vmem>>, vector<1x16x128xf32>,
    } else {
    }
    return
  }
  func.func @transform_0(%arg0: i32, %arg1: i32) -> (i32, i32) {
    %c1_i32 = arith.constant 1 : i32
    %0 = arith.muli %arg0, %c1_i32 : i32
    %1 = arith.addi %0, %arg1 : i32
    %c0_i32 = arith.constant 0 : i32
    %c0_i32_0 = arith.constant 0 : i32
    return %1, %c0_i32 : i32, i32
  }
  func.func @transform_1(%arg0: i32, %arg1: i32) -> (i32, i32) {
    %c1_i32 = arith.constant 1 : i32
    %0 = arith.muli %arg0, %c1_i32 : i32
    %1 = arith.addi %0, %arg1 : i32
    %c0_i32 = arith.constant 0 : i32
    %c0_i32_0 = arith.constant 0 : i32
    return %1, %c0_i32 : i32, i32
  }
  func.func @transform_2(%arg0: i32, %arg1: i32) -> (i32, i32, i32) {
    %c0_i32 = arith.constant 0 : i32
    %c0_i32_0 = arith.constant 0 : i32
    %c0_i32_1 = arith.constant 0 : i32
    return %arg0, %c0_i32, %c0_i32_0 : i32, i32, i32
  }
}

</mosaic_0001>

<bundles_post_ra>
// kernel: tpu_custom_call.1
= control target key start
LH: loop header
LB: loop body
LE: loop exit
PB: predicated region body
PF: predicated region fallthrough
CT: control target
= control target key end

     0   :  { %7 = vsyncpa [#allocation3], 0  ;;  %s251_s0 = inlined_call_operand.hbm [shape: f32[16,128], index: 0, kind: input, shape index: {}]   ;;  %s252_s1 = inlined_call_operand.hbm [shape: f32[16,128], index: 1, kind: input, shape index: {}]   ;;  %s253_s2 = inlined_call_operand.hbm [shape: f32[1,16,128], index: 2, kind: output, shape index: {}]  }
   0x1   :  { %8 = vsyncpa [#allocation6], 0 }
   0x2   :  { %9 = vsyncpa [#allocation4], 0  ;;  %s213_s9 = smov [#allocation2]  }
   0x3   :  { %s19_s10 = sshll.u32 %s213_s9, 4  ;;  %s20_s10 = int_to_ptr.vmem [resolvable:$true] %s19_s10 }
   0x4   :  { %s155_s11 = scalar_lea.vmem %s20_s10, 256  ;;  %p160_p1 = scmp.lt.s32.totalorder %s20_s10, %s20_s10 }
   0x5   :  { %p156_p0 = scmp.ne.s32.totalorder %s20_s10, %s155_s11  ;;  %p161_p2 = scmp.lt.s32.totalorder %s155_s11, %s155_s11 }
   0x7   :  { %p162_p3 = por %p161_p2, %p160_p1 }
   0x9   :  { %p163_p4 = pnand %p162_p3, %p156_p0 }
   0xb   :  { %166 = shalt.err (!%p163_p4)
}
   0xc   :  { %s214_s12 = smov 128   ;;  %s215_s13 = smov 8  }
   0xd   :  { %25 = dma.hbm_to_vmem [thread:$0]  %s251_s0, 256, %s20_s10, [#allocation3], %s214_s12, %s214_s12, %s215_s13  }
   0xe   :  { %s216_s16 = smov [#allocation5]  }
   0xf   :  { %s35_s17 = sshll.u32 %s216_s16, 4  ;;  %s36_s17 = int_to_ptr.vmem [resolvable:$true] %s35_s17 }
  0x10   :  { %s175_s18 = scalar_lea.vmem %s36_s17, 256  ;;  %p180_p6 = scmp.lt.s32.totalorder %s36_s17, %s36_s17 }
  0x11   :  { %p176_p5 = scmp.ne.s32.totalorder %s36_s17, %s175_s18  ;;  %p181_p7 = scmp.lt.s32.totalorder %s175_s18, %s175_s18 }
  0x13   :  { %p182_p8 = por %p181_p7, %p180_p6 }
  0x15   :  { %p183_p9 = pnand %p182_p8, %p176_p5 }
  0x17   :  { %186 = shalt.err (!%p183_p9)
}
  0x18   :  { %41 = dma.hbm_to_vmem [thread:$0]  %s252_s1, 256, %s36_s17, [#allocation6], %s214_s12, %s214_s12, %s215_s13  }
  0x19   :  { %207 = dma.done.wait [#allocation3], 256  }
  0x1a   :  { %208 = vsyncadd [#allocation3], 4294967040 }
  0x1b   :  { %209 = dma.done.wait [#allocation6], 256  }
  0x1c   :  { %210 = vsyncadd [#allocation6], 4294967040  ;;  %v58_v0 = vld [vmem:[#allocation2] sm:$0xff]  ;;  %v60_v1 = vld [vmem:[#allocation5] sm:$0xff]  ;;  %s217_s0 = smov [#allocation7]  }
  0x1d   :  { %v59_v2 = vld [vmem:[#allocation2 + $0x8] sm:$0xff]  ;;  %v62_v3 = vsub.f32 %v58_v0, %v60_v1  ;;  %v61_v4 = vld [vmem:[#allocation5 + $0x8] sm:$0xff]  ;;  %s124_s1 = sshll.u32 %s217_s0, 4  ;;  %s125_s1 = int_to_ptr.vmem [resolvable:$true] %s124_s1 }
  0x1e   :  { %v63_v5 = vsub.f32 %v59_v2, %v61_v4  ;;  %s187_s21 = scalar_lea.vmem %s125_s1, 256  ;;  %p192_p11 = scmp.lt.s32.totalorder %s125_s1, %s125_s1 }
  0x1f   :  { %v64_v6 = vmul.f32 %v62_v3, %v62_v3  ;;  %p188_p10 = scmp.ne.s32.totalorder %s125_s1, %s187_s21  ;;  %p193_p12 = scmp.lt.s32.totalorder %s187_s21, %s187_s21 }
  0x20   :  { %v65_v7 = vmul.f32 %v63_v5, %v63_v5 }
  0x21   :  { %v66_v8 = vadd.f32 1e-12, %v64_v6  ;;  %p194_p13 = por %p193_p12, %p192_p11 }
  0x22   :  { %v67_v9 = vadd.f32 1e-12, %v65_v7 }
  0x23   :  { %143 = vrsqrt.f32 %v66_v8  ;;  %vm70_vm0 = vcmp.eq.f32.partialorder %v66_v8, inf  ;;  %v73_v11 = vand.u32 2147483648, %v66_v8  ;;  %vm72_vm1 = vcmp.eq.f32.partialorder %v66_v8, 0.0  ;;  %p195_p0 = pnand %p194_p13, %p188_p10 }
  0x24   :  { %145 = vrsqrt.f32 %v67_v9  ;;  %vm77_vm2 = vcmp.eq.f32.partialorder %v67_v9, inf  ;;  %v80_v14 = vand.u32 2147483648, %v67_v9  ;;  %vm79_vm3 = vcmp.eq.f32.partialorder %v67_v9, 0.0 }
  0x30   :  { %v144_v10 = vpop.eup %143 }
  0x31   :  { %v146_v12 = vpop.eup %145  ;;  %v69_v13 = vmul.f32 %v144_v10, %v66_v8 }
  0x32   :  { %v76_v15 = vmul.f32 %v146_v12, %v67_v9 }
  0x33   :  { %v71_v16 = vsel %vm70_vm0, %v66_v8, %v69_v13 }
  0x34   :  { %v74_v17 = vsel %vm72_vm1, %v73_v11, %v71_v16  ;;  %v78_v18 = vsel %vm77_vm2, %v67_v9, %v76_v15 }
  0x35   :  { %v81_v19 = vsel %vm79_vm3, %v80_v14, %v78_v18  ;;  %95 = vst [vmem:[#allocation7] sm:$0xff] %v74_v17 }
  0x36   :  { %96 = vst [vmem:[#allocation7 + $0x8] sm:$0xff] %v81_v19 }
  0x37   :  { %198 = shalt.err (!%p195_p0)
}
  0x38   :  { %130 = dma.vmem_to_hbm [thread:$0]  %s125_s1, 256, %s253_s2, [#allocation4], %s214_s12, %s214_s12, %s215_s13  }
  0x39   :  { %211 = dma.done.wait [#allocation4], 256  }
  0x3a   :  { %212 = vsyncadd [#allocation4], 4294967040 }
  0x3b   :  { %134 = vsyncpa [#allocation3], 1 }
  0x3c   :  { %135 = vsyncpa [#allocation6], 1 }
  0x3d   :  { %136 = vsyncpa [#allocation4], 1 }

</bundles_post_ra>
